<compile_context>
chip_gen: v7x
topology: tpu7x:2x2x1
jax: 0.10.0
libtpu: 0.0.40
codegen_flags: <defaults>
</compile_context>

<pallas_src>
import jax
import jax.numpy as jnp
from jax import lax
from jax.experimental import pallas as pl
from jax.experimental.pallas import tpu as pltpu


def _round_up(x, m):
    return ((x + m - 1) // m) * m


# ----------------------------------------------------------------------------
# Two-kernel bidirectional LSTM + linear head
# ----------------------------------------------------------------------------
def bilstm_classifier_kernels(x_p, len_p, wih_all, bias_all,
                              whh_f, whh_b, w_out, b_out, *, tc, bt):
    """x_p: (Tp, Bp, Ep) bf16, gates/weights pre-packed in [i|f|o|g] gate order."""
    Tp, Bp, Ep = x_p.shape
    G8 = wih_all.shape[1]          # 8 * Hp  ([fwd gates | bwd gates])
    Hp = G8 // 8
    Op = w_out.shape[1]
    NC = Tp // tc                  # number of time chunks
    NB = Bp // bt                  # number of batch blocks

    # ---------------- Phase 1: hoisted input projection ----------------
    # gates_x[t, b, :] = x[t, b, :] @ [W_ih_f | W_ih_b] + [b_f | b_b]   (f32)
    def proj_kernel(x_ref, w_ref, b_ref, g_ref):
        x2d = x_ref[...].reshape(tc * bt, Ep)                       # (TC*BT, Ep) bf16
        g = (jnp.dot(x2d, w_ref[...], preferred_element_type=jnp.float32)
             + b_ref[...])                                          # bias folded in here
        g_ref[...] = g.reshape(tc, bt, G8)

    gates = pl.pallas_call(
        proj_kernel,
        out_shape=jax.ShapeDtypeStruct((Tp, Bp, G8), jnp.float32),
        grid_spec=pltpu.PrefetchScalarGridSpec(
            num_scalar_prefetch=0,
            grid=(NB, NC),
            in_specs=[
                pl.BlockSpec((tc, bt, Ep), lambda b, t: (t, b, 0)),   # x chunk (streamed)
                pl.BlockSpec((Ep, G8), lambda b, t: (0, 0)),          # W_ih (both dirs) bf16
                pl.BlockSpec((1, G8), lambda b, t: (0, 0)),           # bias (both dirs) f32
            ],
            out_specs=pl.BlockSpec((tc, bt, G8), lambda b, t: (t, b, 0)),
        ),
        compiler_params=pltpu.CompilerParams(
            dimension_semantics=("parallel", "parallel"),
            vmem_limit_bytes=32 * 1024 * 1024,
        ),
    )(x_p, wih_all, bias_all)

    # ---------------- Phase 2: recurrence (h @ W_hh only) + fused head ----------------
    unroll = True if tc <= 16 else 4

    def rec_kernel(gf_ref, gb_ref, len_ref, whh_f_ref, whh_b_ref,
                   w_out_ref, b_out_ref, out_ref,
                   hf_sc, cf_sc, hb_sc, cb_sc):
        i = pl.program_id(1)
        nc = pl.num_programs(1)

        @pl.when(i == 0)
        def _():
            z = jnp.zeros((bt, Hp), jnp.float32)
            hf_sc[...] = z
            cf_sc[...] = z
            hb_sc[...] = z
            cb_sc[...] = z

        lens = len_ref[...]                       # (BT, 1) int32, hoisted
        t0 = i * tc                               # global time offset of the forward chunk

        def cell(gx, h, c, whh_ref):
            # gates already contain x-projection + bias; only the recurrent matmul here.
            g = gx + jnp.dot(h.astype(jnp.bfloat16), whh_ref[...],
                             preferred_element_type=jnp.float32)    # (BT, 4Hp) f32
            # Gate order packed as [i|f|o|g]: one sigmoid over a contiguous 3Hp slice.
            sig = jax.nn.sigmoid(g[:, 0:3 * Hp])
            i_g = sig[:, 0:Hp]
            f_g = sig[:, Hp:2 * Hp]
            o_g = sig[:, 2 * Hp:3 * Hp]
            g_g = jnp.tanh(g[:, 3 * Hp:4 * Hp])
            c_new = f_g * c + i_g * g_g
            h_new = o_g * jnp.tanh(c_new)
            return h_new, c_new

        def body(s, carry):
            hf, cf, hb, cb = carry
            t_f = t0 + s                          # global forward time
            t_b = Tp - 1 - t_f                    # global backward time
            hf_n, cf_n = cell(gf_ref[s], hf, cf, whh_f_ref)
            hb_n, cb_n = cell(gb_ref[tc - 1 - s], hb, cb, whh_b_ref)
            m_f = t_f < lens                      # packed-sequence masks (BT, 1)
            m_b = t_b < lens
            hf = jnp.where(m_f, hf_n, hf)
            cf = jnp.where(m_f, cf_n, cf)
            hb = jnp.where(m_b, hb_n, hb)
            cb = jnp.where(m_b, cb_n, cb)
            return hf, cf, hb, cb

        carry0 = (hf_sc[...], cf_sc[...], hb_sc[...], cb_sc[...])
        hf, cf, hb, cb = lax.fori_loop(0, tc, body, carry0, unroll=unroll)
        hf_sc[...] = hf
        cf_sc[...] = cf
        hb_sc[...] = hb
        cb_sc[...] = cb

        # Fused linear head at the last time chunk: [h_fwd, h_bwd] @ W_out + b_out,
        # done as two matmuls to avoid a lane concatenate; lane-dense (BT, Op) store.
        @pl.when(i == nc - 1)
        def _():
            w_f = w_out_ref[0:Hp, :]
            w_b = w_out_ref[Hp:2 * Hp, :]
            out_ref[...] = (jnp.dot(hf, w_f, preferred_element_type=jnp.float32)
                            + jnp.dot(hb, w_b, preferred_element_type=jnp.float32)
                            + b_out_ref[...])

    c2 = lambda b, i: (0, 0)

    out = pl.pallas_call(
        rec_kernel,
        out_shape=jax.ShapeDtypeStruct((Bp, Op), jnp.float32),
        grid_spec=pltpu.PrefetchScalarGridSpec(
            num_scalar_prefetch=0,
            grid=(NB, NC),
            in_specs=[
                # forward gates: time chunk i, column block 0 (= [0:4Hp])
                pl.BlockSpec((tc, bt, 4 * Hp), lambda b, i: (i, b, 0)),
                # backward gates: time chunk NC-1-i, column block 1 (= [4Hp:8Hp])
                pl.BlockSpec((tc, bt, 4 * Hp), lambda b, i: (NC - 1 - i, b, 1)),
                pl.BlockSpec((bt, 1), lambda b, i: (b, 0)),      # lengths
                pl.BlockSpec((Hp, 4 * Hp), c2),                  # W_hh fwd (bf16)
                pl.BlockSpec((Hp, 4 * Hp), c2),                  # W_hh bwd (bf16)
                pl.BlockSpec((2 * Hp, Op), c2),                  # W_out (f32)
                pl.BlockSpec((1, Op), c2),                       # b_out (f32)
            ],
            out_specs=pl.BlockSpec((bt, Op), lambda b, i: (b, 0)),
            scratch_shapes=[pltpu.VMEM((bt, Hp), jnp.float32)] * 4,   # hf, cf, hb, cb
        ),
        compiler_params=pltpu.CompilerParams(
            dimension_semantics=("parallel", "arbitrary"),
            vmem_limit_bytes=32 * 1024 * 1024,
        ),
    )(gates, gates, len_p, whh_f, whh_b, w_out, b_out)

    return out


# ----------------------------------------------------------------------------
# Parameter packing helpers: pad + reorder gate columns [i|f|g|o] -> [i|f|o|g]
# ----------------------------------------------------------------------------
def _pack_gate_weight(w, H, Hp, in_dim, in_dim_p):
    w4 = w.reshape(in_dim, 4, H)          # columns: i, f, g, o (PyTorch order)
    w4 = w4[:, (0, 1, 3, 2), :]           # -> i, f, o, g (contiguous sigmoid block)
    w4 = jnp.pad(w4, ((0, in_dim_p - in_dim), (0, 0), (0, Hp - H)))
    return w4.reshape(in_dim_p, 4 * Hp)


def _pack_gate_bias(b, H, Hp):
    b4 = b.reshape(1, 4, H)
    b4 = b4[:, (0, 1, 3, 2), :]
    b4 = jnp.pad(b4, ((0, 0), (0, 0), (0, Hp - H)))
    return b4.reshape(1, 4 * Hp)


# ----------------------------------------------------------------------------
# Forward pass (glue in plain JAX, hot loops in Pallas)
# ----------------------------------------------------------------------------
def lstm_classifier_forward(params, token_ids, lengths):
    B, T = token_ids.shape
    E = params["embedding"].shape[1]
    H = params["w_hh_f"].shape[0]
    O = params["w_out"].shape[1]

    # torch.sort(lengths, descending=True)
    order = jnp.argsort(-lengths)
    sorted_lengths = lengths[order]
    sorted_batch = token_ids[order]

    # GloVe embedding lookup in bf16 (dropout p=0 and GaussianNoise sigma=0 -> identity)
    emb_bf16 = params["embedding"].astype(jnp.bfloat16)
    embedded = emb_bf16[sorted_batch]                         # (B, T, E) bf16
    x_tbe = jnp.transpose(embedded, (1, 0, 2))                # (T, B, E) time-major

    # Lane / sublane / chunk friendly padding.
    TC = 8                                    # time-chunk (fully unrolled in-kernel)
    Tp = _round_up(T, TC)
    Bp16 = _round_up(B, 16)                   # bf16 sublane packing
    BT = min(Bp16, 64)                        # batch tile: bounds vreg pressure, feeds megacore
    Bp = _round_up(Bp16, BT)
    Ep = _round_up(E, 128)
    Hp = _round_up(H, 128)
    Op = _round_up(O, 128)

    x_p = jnp.zeros((Tp, Bp, Ep), jnp.bfloat16).at[:T, :B, :E].set(x_tbe)
    len_p = jnp.zeros((Bp, 1), jnp.int32).at[:B, 0].set(sorted_lengths.astype(jnp.int32))

    wih_f = _pack_gate_weight(params["w_ih_f"], H, Hp, E, Ep).astype(jnp.bfloat16)
    wih_b = _pack_gate_weight(params["w_ih_b"], H, Hp, E, Ep).astype(jnp.bfloat16)
    whh_f = _pack_gate_weight(params["w_hh_f"], H, Hp, H, Hp).astype(jnp.bfloat16)
    whh_b = _pack_gate_weight(params["w_hh_b"], H, Hp, H, Hp).astype(jnp.bfloat16)
    b_f = _pack_gate_bias(params["b_f"], H, Hp)
    b_b = _pack_gate_bias(params["b_b"], H, Hp)

    # Combined input-projection weight / bias for both directions: one big matmul per chunk.
    wih_all = jnp.concatenate([wih_f, wih_b], axis=1)          # (Ep, 8Hp) bf16
    bias_all = jnp.concatenate([b_f, b_b], axis=1)             # (1, 8Hp) f32

    w_out = params["w_out"]                                    # (2H, O)
    w_out_f = jnp.pad(w_out[:H], ((0, Hp - H), (0, Op - O)))
    w_out_b = jnp.pad(w_out[H:], ((0, Hp - H), (0, Op - O)))
    w_out_p = jnp.concatenate([w_out_f, w_out_b], axis=0)      # (2Hp, Op)
    b_out_p = jnp.pad(params["b_out"], ((0, 0), (0, Op - O)))  # (1, Op)

    out_p = bilstm_classifier_kernels(x_p, len_p, wih_all, bias_all,
                                      whh_f, whh_b, w_out_p, b_out_p,
                                      tc=TC, bt=BT)            # (Bp, Op)
    out = out_p[:B, :O]

    # unsorted_output[indices] = output
    return jnp.zeros_like(out).at[order].set(out)


# ----------------------------------------------------------------------------
# Pure-JAX reference (for correctness check)
# ----------------------------------------------------------------------------
def _ref_dir(x_bte, lengths, wih, whh, b, reverse):
    B, T, E = x_bte.shape
    H = whh.shape[0]
    ts = jnp.arange(T)
    if reverse:
        ts = ts[::-1]

    def step(carry, t):
        h, c = carry
        xt = x_bte[:, t, :]
        gates = xt @ wih + h @ whh + b
        i = jax.nn.sigmoid(gates[:, 0:H])
        f = jax.nn.sigmoid(gates[:, H:2 * H])
        g = jnp.tanh(gates[:, 2 * H:3 * H])
        o = jax.nn.sigmoid(gates[:, 3 * H:4 * H])
        cn = f * c + i * g
        hn = o * jnp.tanh(cn)
        m = (t < lengths)[:, None]
        return (jnp.where(m, hn, h), jnp.where(m, cn, c)), None

    init = (jnp.zeros((B, H), jnp.float32), jnp.zeros((B, H), jnp.float32))
    (h, _), _ = lax.scan(step, init, ts)
    return h


def reference_forward(params, token_ids, lengths):
    order = jnp.argsort(-lengths)
    sorted_lengths = lengths[order]
    sorted_batch = token_ids[order]
    embedded = params["embedding"][sorted_batch]
    h_fwd = _ref_dir(embedded, sorted_lengths, params["w_ih_f"], params["w_hh_f"],
                     params["b_f"], reverse=False)
    h_bwd = _ref_dir(embedded, sorted_lengths, params["w_ih_b"], params["w_hh_b"],
                     params["b_b"], reverse=True)
    ht = jnp.concatenate([h_fwd, h_bwd], axis=1)
    out = ht @ params["w_out"] + params["b_out"]
    return jnp.zeros_like(out).at[order].set(out)


# ----------------------------------------------------------------------------
if __name__ == "__main__":
    B, T, E, H, V, O = 4, 8, 32, 32, 50, 1

    key = jax.random.PRNGKey(0)
    ks = jax.random.split(key, 10)
    params = {
        "embedding": 0.1 * jax.random.normal(ks[0], (V, E), jnp.float32),
        "w_ih_f": 0.1 * jax.random.normal(ks[1], (E, 4 * H), jnp.float32),
        "w_hh_f": 0.1 * jax.random.normal(ks[2], (H, 4 * H), jnp.float32),
        "b_f": 0.1 * jax.random.normal(ks[3], (1, 4 * H), jnp.float32),
        "w_ih_b": 0.1 * jax.random.normal(ks[4], (E, 4 * H), jnp.float32),
        "w_hh_b": 0.1 * jax.random.normal(ks[5], (H, 4 * H), jnp.float32),
        "b_b": 0.1 * jax.random.normal(ks[6], (1, 4 * H), jnp.float32),
        "w_out": 0.1 * jax.random.normal(ks[7], (2 * H, O), jnp.float32),
        "b_out": 0.1 * jax.random.normal(ks[8], (1, O), jnp.float32),
    }

    token_ids = jax.random.randint(ks[9], (B, T), 0, V, dtype=jnp.int32)
    lengths = jnp.array([8, 5, 3, 6], dtype=jnp.int32)  # valid seq lengths <= T

    out = jax.block_until_ready(lstm_classifier_forward(params, token_ids, lengths))
    ref = jax.block_until_ready(reference_forward(params, token_ids, lengths))

    assert out.shape == (B, O), out.shape
    # Kernel uses bf16 matmul inputs (f32 accumulation/state); reference is full f32.
    assert bool(jnp.allclose(out, ref, rtol=2e-2, atol=2e-2)), (out, ref)
    print("KERNEL_OK")
</pallas_src>

<mosaic_0001>
module attributes {stable_mosaic.version = 11 : i64} {
  func.func @proj_kernel(%arg0: i32, %arg1: i32, %arg2: memref<8x16x128xbf16, #tpu.memory_space<vmem>>, %arg3: memref<128x1024xbf16, #tpu.memory_space<vmem>>, %arg4: memref<1x1024xf32, #tpu.memory_space<vmem>>, %arg5: memref<8x16x1024xf32, #tpu.memory_space<vmem>>) attributes {dimension_semantics = [#tpu.dimension_semantics<parallel>, #tpu.dimension_semantics<parallel>], iteration_bounds = array<i64: 1, 1>, scalar_prefetch = 0 : i64, scratch_operands = 0 : i64, tpu.core_type = #tpu.core_type<tc>, window_params = [{transform_indices = @transform_0, window_bounds = array<i64: 8, 16, 128>}, {pipeline_mode = #tpu.pipeline_mode<synchronous>, transform_indices = @transform_1, window_bounds = array<i64: 128, 1024>}, {pipeline_mode = #tpu.pipeline_mode<synchronous>, transform_indices = @transform_2, window_bounds = array<i64: 1, 1024>}, {transform_indices = @transform_3, window_bounds = array<i64: 8, 16, 1024>}]} {
    %c0 = arith.constant 0 : index
    %c0_0 = arith.constant 0 : index
    %c0_1 = arith.constant 0 : index
    %0 = vector.load %arg2[%c0, %c0_0, %c0_1] : memref<8x16x128xbf16, #tpu.memory_space<vmem>>, vector<8x16x128xbf16>
    %1 = vector.shape_cast %0 : vector<8x16x128xbf16> to vector<128x128xbf16>
    %c0_2 = arith.constant 0 : index
    %c0_3 = arith.constant 0 : index
    %2 = vector.load %arg3[%c0_2, %c0_3] : memref<128x1024xbf16, #tpu.memory_space<vmem>>, vector<128x1024xbf16>
    %cst = arith.constant dense<0.000000e+00> : vector<128x1024xf32>
    %3 = tpu.matmul %1, %2, %cst {dimension_numbers = #tpu.dot_dimension_numbers<[1], [0], [0], [1], [0, 0, 1, 1], [], []>} : vector<128x128xbf16>, vector<128x1024xbf16>, vector<128x1024xf32> -> vector<128x1024xf32>
    %c0_4 = arith.constant 0 : index
    %c0_5 = arith.constant 0 : index
    %4 = vector.load %arg4[%c0_4, %c0_5] : memref<1x1024xf32, #tpu.memory_space<vmem>>, vector<1x1024xf32>
    %5 = vector.broadcast %4 : vector<1x1024xf32> to vector<128x1024xf32>
    %6 = arith.addf %3, %5 : vector<128x1024xf32>
    %7 = vector.shape_cast %6 : vector<128x1024xf32> to vector<8x16x1024xf32>
    %c0_6 = arith.constant 0 : index
    %c0_7 = arith.constant 0 : index
    %c0_8 = arith.constant 0 : index
    %8 = vector.load %arg5[%c0_6, %c0_7, %c0_8] : memref<8x16x1024xf32, #tpu.memory_space<vmem>>, vector<8x16x1024xf32>
    tpu.vector_store %arg5[%c0_6, %c0_7, %c0_8], %7 {strides = array<i32>} : memref<8x16x1024xf32, #tpu.memory_space<vmem>>, vector<8x16x1024xf32>,
    return
  }
  func.func @transform_0(%arg0: i32, %arg1: i32) -> (i32, i32, i32) {
    %c0_i32 = arith.constant 0 : i32
    %c0_i32_0 = arith.constant 0 : i32
    return %arg1, %arg0, %c0_i32 : i32, i32, i32
  }
  func.func @transform_1(%arg0: i32, %arg1: i32) -> (i32, i32) {
    %c0_i32 = arith.constant 0 : i32
    %c0_i32_0 = arith.constant 0 : i32
    %c0_i32_1 = arith.constant 0 : i32
    return %c0_i32, %c0_i32_0 : i32, i32
  }
  func.func @transform_2(%arg0: i32, %arg1: i32) -> (i32, i32) {
    %c0_i32 = arith.constant 0 : i32
    %c0_i32_0 = arith.constant 0 : i32
    %c0_i32_1 = arith.constant 0 : i32
    return %c0_i32, %c0_i32_0 : i32, i32
  }
  func.func @transform_3(%arg0: i32, %arg1: i32) -> (i32, i32, i32) {
    %c0_i32 = arith.constant 0 : i32
    %c0_i32_0 = arith.constant 0 : i32
    return %arg1, %arg0, %c0_i32 : i32, i32, i32
  }
}

</mosaic_0001>

<bundles_post_ra>
// kernel: tpu_custom_call.1
= control target key start
LH: loop header
LB: loop body
LE: loop exit
PB: predicated region body
PF: predicated region fallthrough
CT: control target
= control target key end

     0   :  { %8 = vsyncpa [#allocation3], 0  ;;  %s1622_s0 = inlined_call_operand.hbm [shape: bf16[8,16,128], index: 0, kind: input, shape index: {}]   ;;  %s1623_s1 = inlined_call_operand.hbm [shape: bf16[128,1024], index: 1, kind: input, shape index: {}]   ;;  %s1624_s2 = inlined_call_operand.hbm [shape: f32[1,1024], index: 2, kind: input, shape index: {}]   ;;  %s1625_s3 = inlined_call_operand.hbm [shape: f32[8,16,1024], index: 3, kind: output, shape index: {}]  }
   0x1   :  { %9 = vsyncpa [#allocation6], 0 }
   0x2   :  { %10 = vsyncpa [#allocation4], 0  ;;  %s1327_s12 = smov [#allocation5]   ;;  %s1233_s16 = scalar_lea.hbm %s1623_s1, 8192 }
   0x3   :  { %s28_s13 = sshll.u32 %s1327_s12, 4  ;;  %p1234_p0 = scmp.ne.s32.totalorder %s1623_s1, %s1233_s16  ;;  %s29_s13 = int_to_ptr.vmem [resolvable:$true] %s28_s13 }
   0x4   :  { %p1237_p1 = scmp.lt.u32.totalorder %s1233_s16, %s1623_s1 }
   0x6   :  { %p1239_p2 = pnand %p1237_p1, %p1234_p0 }
   0x8   :  { %1242 = shalt.err (!%p1239_p2)
}
   0x9   :  { %s1243_s21 = scalar_lea.vmem %s29_s13, 8192  ;;  %p1248_p4 = scmp.lt.s32.totalorder %s29_s13, %s29_s13 }
   0xa   :  { %p1244_p3 = scmp.ne.s32.totalorder %s29_s13, %s1243_s21  ;;  %p1249_p5 = scmp.lt.s32.totalorder %s1243_s21, %s1243_s21 }
   0xc   :  { %p1250_p6 = por %p1249_p5, %p1248_p4 }
   0xe   :  { %p1251_p7 = pnand %p1250_p6, %p1244_p3 }
  0x10   :  { %1254 = shalt.err (!%p1251_p7)
}
  0x11   :  { %s1328_s22 = smov 512   ;;  %s1329_s23 = smov 32  }
  0x12   :  { %34 = dma.hbm_to_vmem [thread:$0]  %s1623_s1, 8192, %s29_s13, [#allocation6], %s1328_s22, %s1328_s22, %s1329_s23  }
  0x13   :  { %s1330_s26 = smov [#allocation2]   ;;  %s1255_s30 = scalar_lea.hbm %s1622_s0, 1024 }
  0x14   :  { %s16_s27 = sshll.u32 %s1330_s26, 4  ;;  %p1256_p8 = scmp.ne.s32.totalorder %s1622_s0, %s1255_s30  ;;  %s17_s27 = int_to_ptr.vmem [resolvable:$true] %s16_s27 }
  0x15   :  { %p1259_p9 = scmp.lt.u32.totalorder %s1255_s30, %s1622_s0 }
  0x17   :  { %p1261_p10 = pnand %p1259_p9, %p1256_p8 }
  0x19   :  { %1264 = shalt.err (!%p1261_p10)
}
  0x1a   :  { %s1265_s8 = scalar_lea.vmem %s17_s27, 1024  ;;  %p1270_p12 = scmp.lt.s32.totalorder %s17_s27, %s17_s27 }
  0x1b   :  { %p1266_p11 = scmp.ne.s32.totalorder %s17_s27, %s1265_s8  ;;  %p1271_p13 = scmp.lt.s32.totalorder %s1265_s8, %s1265_s8 }
  0x1d   :  { %p1272_p0 = por %p1271_p13, %p1270_p12 }
  0x1f   :  { %p1273_p1 = pnand %p1272_p0, %p1266_p11 }
  0x21   :  { %1276 = shalt.err (!%p1273_p1)
}
  0x22   :  { %s1331_s1 = smov 64   ;;  %s1332_s9 = smov 4  }
  0x23   :  { %22 = dma.hbm_to_vmem [thread:$0]  %s1622_s0, 1024, %s17_s27, [#allocation3], %s1331_s1, %s1331_s1, %s1332_s9  }
  0x24   :  { %s1333_s12 = smov [#allocation7]   ;;  %s1277_s16 = scalar_lea.hbm %s1624_s2, 128 }
  0x25   :  { %s41_s13 = sshll.u32 %s1333_s12, 4  ;;  %p1278_p2 = scmp.ne.s32.totalorder %s1624_s2, %s1277_s16  ;;  %s42_s13 = int_to_ptr.vmem [resolvable:$true] %s41_s13 }
  0x26   :  { %p1281_p3 = scmp.lt.u32.totalorder %s1277_s16, %s1624_s2 }
  0x28   :  { %p1283_p4 = pnand %p1281_p3, %p1278_p2 }
  0x2a   :  { %1286 = shalt.err (!%p1283_p4)
}
  0x2b   :  { %s1287_s21 = scalar_lea.vmem %s42_s13, 128  ;;  %p1292_p6 = scmp.lt.s32.totalorder %s42_s13, %s42_s13 }
  0x2c   :  { %p1288_p5 = scmp.ne.s32.totalorder %s42_s13, %s1287_s21  ;;  %p1293_p7 = scmp.lt.s32.totalorder %s1287_s21, %s1287_s21 }
  0x2e   :  { %p1294_p8 = por %p1293_p7, %p1292_p6 }
  0x30   :  { %p1295_p9 = pnand %p1294_p8, %p1288_p5 }
  0x32   :  { %1298 = shalt.err (!%p1295_p9)
}
  0x33   :  { %44 = dma.hbm_to_vmem [thread:$0]  %s1624_s2, 128, %s42_s13, [#allocation6]  }
  0x34   :  { %1321 = dma.done.wait [#allocation3], 1024  }
  0x35   :  { %1322 = vsyncadd [#allocation3], 4294966272 }
  0x36   :  { %1323 = dma.done.wait [#allocation6], 8320  }
  0x37   :  { %1324 = vsyncadd [#allocation6], 4294958976  ;;  %v1334_v0 = vmov 0   ;;  %v71_v1 = vld [vmem:[#allocation5] sm:$0xff]  ;;  %v72_v3 = vld [vmem:[#allocation5 + $0x8] sm:$0xff]  ;;  %s1335_s2 = smov [#allocation8]  }
  0x38   :  { %577 = vmatprep.mubr.bf16.mxu0 %v1334_v0  ;;  %690 = vmatprep.mubr.bf16.mxu1 %v1334_v0  ;;  %v75_v2 = vld [vmem:[#allocation5 + $0x20] sm:$0xff]  ;;  %v76_v5 = vld [vmem:[#allocation5 + $0x28] sm:$0xff]  ;;  %v73_v63 = vld [vmem:[#allocation5 + $0x10] sm:$0xff]  ;;  %s1130_s23 = sshll.u32 %s1335_s2, 4  ;;  %s1131_s23 = int_to_ptr.vmem [resolvable:$true] %s1130_s23 }
  0x39   :  { %v1152_v4 = vcombine.high %v71_v1, %v75_v2  ;;  %v1151_v6 = vcombine.low %v71_v1, %v75_v2  ;;  %v79_v7 = vld [vmem:[#allocation5 + $0x40] sm:$0xff]  ;;  %v1154_v9 = vcombine.high %v72_v3, %v76_v5  ;;  %v1153_v10 = vcombine.low %v72_v3, %v76_v5  ;;  %v80_v12 = vld [vmem:[#allocation5 + $0x48] sm:$0xff]  ;;  %v77_v1 = vld [vmem:[#allocation5 + $0x30] sm:$0xff]  ;;  %s1299_s24 = scalar_lea.vmem %s1131_s23, 16384  ;;  %p1304_p11 = scmp.lt.s32.totalorder %s1131_s23, %s1131_s23 }
  0x3a   :  { %v83_v8 = vld [vmem:[#allocation5 + $0x60] sm:$0xff]  ;;  %v84_v13 = vld [vmem:[#allocation5 + $0x68] sm:$0xff]  ;;  %v74_v2 = vld [vmem:[#allocation5 + $0x18] sm:$0xff]  ;;  %p1300_p10 = scmp.ne.s32.totalorder %s1131_s23, %s1299_s24  ;;  %p1305_p12 = scmp.lt.s32.totalorder %s1299_s24, %s1299_s24 }
  0x3b   :  { %v1160_v11 = vcombine.high %v79_v7, %v83_v8  ;;  %v87_v14 = vld [vmem:[#allocation5 + $0x80] sm:$0xff]  ;;  %545 = vmatprep.subr.bf16.mxu0 %v1152_v4  ;;  %v1162_v15 = vcombine.high %v80_v12, %v84_v13  ;;  %v88_v17 = vld [vmem:[#allocation5 + $0x88] sm:$0xff]  ;;  %658 = vmatprep.subr.bf16.mxu1 %v1154_v9  ;;  %v1159_v19 = vcombine.low %v79_v7, %v83_v8  ;;  %v78_v3 = vld [vmem:[#allocation5 + $0x38] sm:$0xff] }
  0x3c   :  { %v91_v16 = vld [vmem:[#allocation5 + $0xa0] sm:$0xff]  ;;  %v92_v18 = vld [vmem:[#allocation5 + $0xa8] sm:$0xff]  ;;  %546 = vmatpush1.bf16.msra.mxu0 %v1151_v6  ;;  %659 = vmatpush1.bf16.msra.mxu1 %v1153_v10  ;;  %v1161_v20 = vcombine.low %v80_v12, %v84_v13  ;;  %v1156_v6 = vcombine.high %v73_v63, %v77_v1  ;;  %v1158_v7 = vcombine.high %v74_v2, %v78_v3  ;;  %v81_v9 = vld [vmem:[#allocation5 + $0x50] sm:$0xff]  ;;  %p1306_p13 = por %p1305_p12, %p1304_p11 }
  0x3d   :  { %547 = vmatprep.subr.bf16.mxu0 %v1160_v11  ;;  %v1168_v21 = vcombine.high %v87_v14, %v91_v16  ;;  %660 = vmatprep.subr.bf16.mxu1 %v1162_v15  ;;  %v1170_v22 = vcombine.high %v88_v17, %v92_v18  ;;  %v95_v23 = vld [vmem:[#allocation5 + $0xc0] sm:$0xff]  ;;  %v96_v25 = vld [vmem:[#allocation5 + $0xc8] sm:$0xff]  ;;  %v1167_v27 = vcombine.low %v87_v14, %v91_v16  ;;  %v85_v10 = vld [vmem:[#allocation5 + $0x70] sm:$0xff] }
  0x3e   :  { %v99_v24 = vld [vmem:[#allocation5 + $0xe0] sm:$0xff]  ;;  %v100_v26 = vld [vmem:[#allocation5 + $0xe8] sm:$0xff]  ;;  %v1169_v28 = vcombine.low %v88_v17, %v92_v18  ;;  %v1155_v11 = vcombine.low %v73_v63, %v77_v1  ;;  %v82_v12 = vld [vmem:[#allocation5 + $0x58] sm:$0xff]  ;;  %v1157_v14 = vcombine.low %v74_v2, %v78_v3  ;;  %v1164_v15 = vcombine.high %v81_v9, %v85_v10  ;;  %p1307_p0 = pnand %p1306_p13, %p1300_p10 }
  0x3f   :  { %v1176_v29 = vcombine.high %v95_v23, %v99_v24  ;;  %v1178_v30 = vcombine.high %v96_v25, %v100_v26  ;;  %v103_v31 = vld [vmem:[#allocation5 + $0x100] sm:$0xff]  ;;  %v104_v33 = vld [vmem:[#allocation5 + $0x108] sm:$0xff]  ;;  %v1175_v35 = vcombine.low %v95_v23, %v99_v24  ;;  %v1177_v36 = vcombine.low %v96_v25, %v100_v26  ;;  %v86_v13 = vld [vmem:[#allocation5 + $0x78] sm:$0xff] }
  0x40   :  { %548 = vmatpush1.bf16.msra.mxu0 %v1159_v19  ;;  %661 = vmatpush1.bf16.msra.mxu1 %v1161_v20  ;;  %v107_v32 = vld [vmem:[#allocation5 + $0x120] sm:$0xff]  ;;  %v108_v34 = vld [vmem:[#allocation5 + $0x128] sm:$0xff]  ;;  %v89_v16 = vld [vmem:[#allocation5 + $0x90] sm:$0xff]  ;;  %v1166_v18 = vcombine.high %v82_v12, %v86_v13 }
  0x41   :  { %549 = vmatprep.subr.bf16.mxu0 %v1168_v21  ;;  %662 = vmatprep.subr.bf16.mxu1 %v1170_v22  ;;  %v1184_v37 = vcombine.high %v103_v31, %v107_v32  ;;  %v1186_v38 = vcombine.high %v104_v33, %v108_v34  ;;  %v111_v39 = vld [vmem:[#allocation5 + $0x140] sm:$0xff]  ;;  %v112_v41 = vld [vmem:[#allocation5 + $0x148] sm:$0xff]  ;;  %v1183_v43 = vcombine.low %v103_v31, %v107_v32  ;;  %v93_v17 = vld [vmem:[#allocation5 + $0xb0] sm:$0xff] }
  0x42   :  { %v115_v40 = vld [vmem:[#allocation5 + $0x160] sm:$0xff]  ;;  %v116_v42 = vld [vmem:[#allocation5 + $0x168] sm:$0xff]  ;;  %v1185_v44 = vcombine.low %v104_v33, %v108_v34  ;;  %v90_v19 = vld [vmem:[#allocation5 + $0x98] sm:$0xff]  ;;  %v1163_v21 = vcombine.low %v81_v9, %v85_v10  ;;  %v1165_v22 = vcombine.low %v82_v12, %v86_v13  ;;  %v1172_v23 = vcombine.high %v89_v16, %v93_v17 }
  0x43   :  { %v1192_v45 = vcombine.high %v111_v39, %v115_v40  ;;  %v1194_v46 = vcombine.high %v112_v41, %v116_v42  ;;  %v119_v47 = vld [vmem:[#allocation5 + $0x180] sm:$0xff]  ;;  %v120_v49 = vld [vmem:[#allocation5 + $0x188] sm:$0xff]  ;;  %v1191_v51 = vcombine.low %v111_v39, %v115_v40  ;;  %v1193_v52 = vcombine.low %v112_v41, %v116_v42  ;;  %v94_v20 = vld [vmem:[#allocation5 + $0xb8] sm:$0xff] }
  0x44   :  { %550 = vmatpush1.bf16.msra.mxu0 %v1167_v27  ;;  %663 = vmatpush1.bf16.msra.mxu1 %v1169_v28  ;;  %v123_v48 = vld [vmem:[#allocation5 + $0x1a0] sm:$0xff]  ;;  %v124_v50 = vld [vmem:[#allocation5 + $0x1a8] sm:$0xff]  ;;  %v1174_v24 = vcombine.high %v90_v19, %v94_v20  ;;  %v97_v26 = vld [vmem:[#allocation5 + $0xd0] sm:$0xff]  ;;  %v1173_v31 = vcombine.low %v90_v19, %v94_v20 }
  0x45   :  { %551 = vmatprep.subr.bf16.mxu0 %v1176_v29  ;;  %664 = vmatprep.subr.bf16.mxu1 %v1178_v30  ;;  %v1200_v53 = vcombine.high %v119_v47, %v123_v48  ;;  %v127_v54 = vld [vmem:[#allocation5 + $0x1c0] sm:$0xff]  ;;  %v1202_v55 = vcombine.high %v120_v49, %v124_v50  ;;  %v128_v57 = vld [vmem:[#allocation5 + $0x1c8] sm:$0xff]  ;;  %v1199_v59 = vcombine.low %v119_v47, %v123_v48  ;;  %v101_v27 = vld [vmem:[#allocation5 + $0xf0] sm:$0xff] }
  0x46   :  { %v131_v56 = vld [vmem:[#allocation5 + $0x1e0] sm:$0xff]  ;;  %v132_v58 = vld [vmem:[#allocation5 + $0x1e8] sm:$0xff]  ;;  %v1201_v60 = vcombine.low %v120_v49, %v124_v50  ;;  %v98_v28 = vld [vmem:[#allocation5 + $0xd8] sm:$0xff]  ;;  %v1171_v30 = vcombine.low %v89_v16, %v93_v17  ;;  %v1180_v32 = vcombine.high %v97_v26, %v101_v27 }
  0x47   :  { %v1208_v61 = vcombine.high %v127_v54, %v131_v56  ;;  %v1210_v62 = vcombine.high %v128_v57, %v132_v58  ;;  %v1207_v4 = vcombine.low %v127_v54, %v131_v56  ;;  %v1209_v5 = vcombine.low %v128_v57, %v132_v58  ;;  %v1397_v8 = vld [vmem:[#allocation2] sm:$0xff]   ;;  %v1403_v25 = vld [vmem:[#allocation2 + $0x8] sm:$0xff]   ;;  %v102_v29 = vld [vmem:[#allocation5 + $0xf8] sm:$0xff] }
  0x48   :  { %552 = vmatpush1.bf16.msra.mxu0 %v1175_v35  ;;  %665 = vmatpush1.bf16.msra.mxu1 %v1177_v36  ;;  %v1182_v33 = vcombine.high %v98_v28, %v102_v29  ;;  %v105_v34 = vld [vmem:[#allocation5 + $0x110] sm:$0xff]  ;;  %v106_v36 = vld [vmem:[#allocation5 + $0x118] sm:$0xff]  ;;  %v1181_v39 = vcombine.low %v98_v28, %v102_v29  ;;  %v1230_v9 = vld [vmem:[#allocation2 + $0x28] sm:$0xff]  }
  0x49   :  { %553 = vmatprep.subr.bf16.mxu0 %v1184_v37  ;;  %666 = vmatprep.subr.bf16.mxu1 %v1186_v38  ;;  %v109_v35 = vld [vmem:[#allocation5 + $0x130] sm:$0xff]  ;;  %v110_v37 = vld [vmem:[#allocation5 + $0x138] sm:$0xff]  ;;  %v1179_v38 = vcombine.low %v97_v26, %v101_v27 }
  0x4a   :  { %v1188_v40 = vcombine.high %v105_v34, %v109_v35  ;;  %v1409_v41 = vld [vmem:[#allocation2 + $0x10] sm:$0xff]   ;;  %v1190_v42 = vcombine.high %v106_v36, %v110_v37  ;;  %v1187_v47 = vcombine.low %v105_v34, %v109_v35  ;;  %v1189_v48 = vcombine.low %v106_v36, %v110_v37  ;;  %v126_v54 = vld [vmem:[#allocation5 + $0x1b8] sm:$0xff] }
  0x4b   :  { %v1228_v58 = vld [vmem:[#allocation2 + $0x18] sm:$0xff]   ;;  %v1231_v10 = vld [vmem:[#allocation2 + $0x30] sm:$0xff]  }
  0x4c   :  { %554 = vmatpush1.bf16.msra.mxu0 %v1183_v43  ;;  %667 = vmatpush1.bf16.msra.mxu1 %v1185_v44  ;;  %v113_v43 = vld [vmem:[#allocation5 + $0x150] sm:$0xff]  ;;  %v134_v63 = vld [vmem:[#allocation5 + $0x1f8] sm:$0xff] }
  0x4d   :  { %555 = vmatprep.subr.bf16.mxu0 %v1192_v45  ;;  %668 = vmatprep.subr.bf16.mxu1 %v1194_v46  ;;  %v117_v44 = vld [vmem:[#allocation5 + $0x170] sm:$0xff]  ;;  %v114_v45 = vld [vmem:[#allocation5 + $0x158] sm:$0xff] }
  0x4e   :  { %v118_v46 = vld [vmem:[#allocation5 + $0x178] sm:$0xff]  ;;  %v1196_v49 = vcombine.high %v113_v43, %v117_v44 }
  0x4f   :  { %v1198_v50 = vcombine.high %v114_v45, %v118_v46  ;;  %v1197_v56 = vcombine.low %v114_v45, %v118_v46 }
  0x50   :  { %556 = vmatpush1.bf16.msra.mxu0 %v1191_v51  ;;  %669 = vmatpush1.bf16.msra.mxu1 %v1193_v52  ;;  %v121_v51 = vld [vmem:[#allocation5 + $0x190] sm:$0xff] }
  0x51   :  { %557 = vmatprep.subr.bf16.mxu0 %v1200_v53  ;;  %670 = vmatprep.subr.bf16.mxu1 %v1202_v55  ;;  %v125_v52 = vld [vmem:[#allocation5 + $0x1b0] sm:$0xff]  ;;  %v122_v53 = vld [vmem:[#allocation5 + $0x198] sm:$0xff]  ;;  %v1195_v55 = vcombine.low %v113_v43, %v117_v44 }
  0x52   :  { %v1204_v57 = vcombine.high %v121_v51, %v125_v52  ;;  %v1203_v1 = vcombine.low %v121_v51, %v125_v52  ;;  %v1205_v2 = vcombine.low %v122_v53, %v126_v54 }
  0x54   :  { %558 = vmatpush1.bf16.msra.mxu0 %v1199_v59  ;;  %671 = vmatpush1.bf16.msra.mxu1 %v1201_v60  ;;  %v1206_v59 = vcombine.high %v122_v53, %v126_v54  ;;  %v129_v60 = vld [vmem:[#allocation5 + $0x1d0] sm:$0xff] }
  0x55   :  { %559 = vmatprep.subr.bf16.mxu0 %v1208_v61  ;;  %672 = vmatprep.subr.bf16.mxu1 %v1210_v62  ;;  %v133_v61 = vld [vmem:[#allocation5 + $0x1f0] sm:$0xff]  ;;  %v130_v62 = vld [vmem:[#allocation5 + $0x1d8] sm:$0xff] }
  0x56   :  { %v1212_v3 = vcombine.high %v129_v60, %v133_v61 }
  0x58   :  { %560 = vmatpush1.bf16.msra.mxu0 %v1207_v4  ;;  %673 = vmatpush1.bf16.msra.mxu1 %v1209_v5  ;;  %v1214_v4 = vcombine.high %v130_v62, %v134_v63  ;;  %v1211_v5 = vcombine.low %v129_v60, %v133_v61 }
  0x59   :  { %771 = vmatprep.subr.bf16.mxu0 %v1156_v6  ;;  %884 = vmatprep.subr.bf16.mxu1 %v1158_v7  ;;  %v1213_v6 = vcombine.low %v130_v62, %v134_v63  ;;  %v1229_v7 = vld [vmem:[#allocation2 + $0x20] sm:$0xff]  }
  0x5b   :  { %578 = vmatmul.mubr.bf16.vlgmr.msra.gmra.mrb[0].mxu0 %v1397_v8  ;;  %691 = vmatmul.mubr.bf16.vlgmr.msra.gmra.mrb[0].mxu1 %v1397_v8 }
  0x5c   :  { %772 = vmatpush1.bf16.msra.mxu0 %v1155_v11  ;;  %885 = vmatpush1.bf16.msra.mxu1 %v1157_v14  ;;  %v1232_v11 = vld [vmem:[#allocation2 + $0x38] sm:$0xff]   ;;  %v1448_v14 = vld [vmem:[#allocation7] sm:$0xff] }
  0x5d   :  { %587 = vmatprep.mubr.bf16.mxu0 %v1334_v0  ;;  %700 = vmatprep.mubr.bf16.mxu1 %v1334_v0 }
  0x5e   :  { %773 = vmatprep.subr.bf16.mxu0 %v1164_v15  ;;  %886 = vmatprep.subr.bf16.mxu1 %v1166_v18 }
  0x60   :  { %774 = vmatpush1.bf16.msra.mxu0 %v1163_v21  ;;  %887 = vmatpush1.bf16.msra.mxu1 %v1165_v22 }
  0x61   :  { %775 = vmatprep.subr.bf16.mxu0 %v1172_v23  ;;  %888 = vmatprep.subr.bf16.mxu1 %v1174_v24 }
  0x63   :  { %588 = vmatmul.mubr.bf16.gmra.mrb[4].mxu0 %v1403_v25  ;;  %701 = vmatmul.mubr.bf16.gmra.mrb[4].mxu1 %v1403_v25 }
  0x64   :  { %597 = vmatprep.mubr.bf16.mxu0 %v1334_v0  ;;  %710 = vmatprep.mubr.bf16.mxu1 %v1334_v0 }
  0x65   :  { %776 = vmatpush1.bf16.msra.mxu0 %v1171_v30  ;;  %889 = vmatpush1.bf16.msra.mxu1 %v1173_v31 }
  0x66   :  { %777 = vmatprep.subr.bf16.mxu0 %v1180_v32  ;;  %890 = vmatprep.subr.bf16.mxu1 %v1182_v33 }
  0x69   :  { %778 = vmatpush1.bf16.msra.mxu0 %v1179_v38  ;;  %891 = vmatpush1.bf16.msra.mxu1 %v1181_v39 }
  0x6a   :  { %779 = vmatprep.subr.bf16.mxu0 %v1188_v40  ;;  %892 = vmatprep.subr.bf16.mxu1 %v1190_v42 }
  0x6b   :  { %598 = vmatmul.mubr.bf16.gmra.mrb[8].mxu0 %v1409_v41  ;;  %711 = vmatmul.mubr.bf16.gmra.mrb[8].mxu1 %v1409_v41 }
  0x6c   :  { %607 = vmatprep.mubr.bf16.mxu0 %v1334_v0  ;;  %720 = vmatprep.mubr.bf16.mxu1 %v1334_v0 }
  0x6d   :  { %780 = vmatpush1.bf16.msra.mxu0 %v1187_v47  ;;  %893 = vmatpush1.bf16.msra.mxu1 %v1189_v48 }
  0x6e   :  { %781 = vmatprep.subr.bf16.mxu0 %v1196_v49  ;;  %894 = vmatprep.subr.bf16.mxu1 %v1198_v50 }
  0x71   :  { %782 = vmatpush1.bf16.msra.mxu0 %v1195_v55  ;;  %895 = vmatpush1.bf16.msra.mxu1 %v1197_v56 }
  0x72   :  { %783 = vmatprep.subr.bf16.mxu0 %v1204_v57  ;;  %896 = vmatprep.subr.bf16.mxu1 %v1206_v59 }
  0x73   :  { %608 = vmatmul.mubr.bf16.gmra.mrb[12].mxu0 %v1228_v58  ;;  %721 = vmatmul.mubr.bf16.gmra.mrb[12].mxu1 %v1228_v58 }
  0x74   :  { %617 = vmatprep.mubr.bf16.mxu0 %v1334_v0  ;;  %730 = vmatprep.mubr.bf16.mxu1 %v1334_v0 }
  0x75   :  { %784 = vmatpush1.bf16.msra.mxu0 %v1203_v1  ;;  %897 = vmatpush1.bf16.msra.mxu1 %v1205_v2 }
  0x76   :  { %785 = vmatprep.subr.bf16.mxu0 %v1212_v3  ;;  %898 = vmatprep.subr.bf16.mxu1 %v1214_v4 }
  0x79   :  { %786 = vmatpush1.bf16.msra.mxu0 %v1211_v5  ;;  %899 = vmatpush1.bf16.msra.mxu1 %v1213_v6 }
  0x7b   :  { %618 = vmatmul.mubr.bf16.gmra.mrb[16].mxu0 %v1229_v7  ;;  %731 = vmatmul.mubr.bf16.gmra.mrb[16].mxu1 %v1229_v7 }
  0x7c   :  { %627 = vmatprep.mubr.bf16.mxu0 %v1334_v0  ;;  %740 = vmatprep.mubr.bf16.mxu1 %v1334_v0 }
  0x83   :  { %628 = vmatmul.mubr.bf16.gmra.mrb[20].mxu0 %v1230_v9  ;;  %741 = vmatmul.mubr.bf16.gmra.mrb[20].mxu1 %v1230_v9 }
  0x84   :  { %637 = vmatprep.mubr.bf16.mxu0 %v1334_v0  ;;  %750 = vmatprep.mubr.bf16.mxu1 %v1334_v0 }
  0x8b   :  { %638 = vmatmul.mubr.bf16.gmra.mrb[24].mxu0 %v1231_v10  ;;  %751 = vmatmul.mubr.bf16.gmra.mrb[24].mxu1 %v1231_v10 }
  0x8c   :  { %647 = vmatprep.mubr.bf16.mxu0 %v1334_v0  ;;  %760 = vmatprep.mubr.bf16.mxu1 %v1334_v0 }
  0x93   :  { %648 = vmatmul.mubr.bf16.gmra.mrb[28].mxu0 %v1232_v11  ;;  %761 = vmatmul.mubr.bf16.gmra.mrb[28].mxu1 %v1232_v11 }
  0x94   :  { %803 = vmatprep.mubr.bf16.mxu0 %v1334_v0  ;;  %916 = vmatprep.mubr.bf16.mxu1 %v1334_v0 }
  0x9b   :  { %804 = vmatmul.mubr.bf16.vlgmr.msra.gmra.mrb[32].mxu0 %v1397_v8  ;;  %917 = vmatmul.mubr.bf16.vlgmr.msra.gmra.mrb[32].mxu1 %v1397_v8  ;;  %v137_v8 = vlaneseq }
  0x9c   :  { %813 = vmatprep.mubr.bf16.mxu0 %v1334_v0  ;;  %926 = vmatprep.mubr.bf16.mxu1 %v1334_v0 }
  0x9d   :  { %v1445_v12 = vshrl.u32 %v137_v8, 7 }
  0x9f   :  { %v139_v13 = vsub.s32 0, %v1445_v12  ;;  %v147_v15 = vsub.s32 2, %v1445_v12  ;;  %v143_v16 = vsub.s32 1, %v1445_v12  ;;  %v151_v17 = vsub.s32 3, %v1445_v12 }
  0xa1   :  { %v1454_v18 = vrot.slane %v1448_v14, %v139_v13  ;;  %v1460_v19 = vrot.slane %v1448_v14, %v143_v16  ;;  %v1463_v20 = vrot.slane %v1448_v14, %v151_v17 }
  0xa3   :  { %814 = vmatmul.mubr.bf16.gmra.mrb[36].mxu0 %v1403_v25  ;;  %927 = vmatmul.mubr.bf16.gmra.mrb[36].mxu1 %v1403_v25 }
  0xa4   :  { %823 = vmatprep.mubr.bf16.mxu0 %v1334_v0  ;;  %936 = vmatprep.mubr.bf16.mxu1 %v1334_v0 }
  0xab   :  { %824 = vmatmul.mubr.bf16.gmra.mrb[40].mxu0 %v1409_v41  ;;  %937 = vmatmul.mubr.bf16.gmra.mrb[40].mxu1 %v1409_v41 }
  0xac   :  { %833 = vmatprep.mubr.bf16.mxu0 %v1334_v0  ;;  %946 = vmatprep.mubr.bf16.mxu1 %v1334_v0 }
  0xb3   :  { %834 = vmatmul.mubr.bf16.gmra.mrb[44].mxu0 %v1228_v58  ;;  %947 = vmatmul.mubr.bf16.gmra.mrb[44].mxu1 %v1228_v58 }
  0xb4   :  { %843 = vmatprep.mubr.bf16.mxu0 %v1334_v0  ;;  %956 = vmatprep.mubr.bf16.mxu1 %v1334_v0 }
  0xbb   :  { %844 = vmatmul.mubr.bf16.gmra.mrb[48].mxu0 %v1229_v7  ;;  %957 = vmatmul.mubr.bf16.gmra.mrb[48].mxu1 %v1229_v7 }
  0xbc   :  { %853 = vmatprep.mubr.bf16.mxu0 %v1334_v0  ;;  %966 = vmatprep.mubr.bf16.mxu1 %v1334_v0 }
  0xc3   :  { %854 = vmatmul.mubr.bf16.gmra.mrb[52].mxu0 %v1230_v9  ;;  %967 = vmatmul.mubr.bf16.gmra.mrb[52].mxu1 %v1230_v9 }
  0xc4   :  { %863 = vmatprep.mubr.bf16.mxu0 %v1334_v0  ;;  %976 = vmatprep.mubr.bf16.mxu1 %v1334_v0 }
  0xcb   :  { %864 = vmatmul.mubr.bf16.gmra.mrb[56].mxu0 %v1231_v10  ;;  %977 = vmatmul.mubr.bf16.gmra.mrb[56].mxu1 %v1231_v10 }
  0xcc   :  { %873 = vmatprep.mubr.bf16.mxu0 %v1334_v0  ;;  %986 = vmatprep.mubr.bf16.mxu1 %v1334_v0  ;;  %v1457_v0 = vrot.slane %v1448_v14, %v147_v15 }
  0xd3   :  { %874 = vmatmul.mubr.bf16.gmra.mrb[60].mxu0 %v1232_v11  ;;  %987 = vmatmul.mubr.bf16.gmra.mrb[60].mxu1 %v1232_v11 }
 0x12e   :  { %v579_v21 = vpop.f32.mrb[0].mxu0  ;;  %v692_v23 = vpop.f32.mrb[0].mxu1 }
 0x12f   :  { %v580_v22 = vadd.f32 %v579_v21, %v1454_v18  ;;  %v581_v24 = vpop.f32.mrb[1].mxu0  ;;  %v693_v25 = vadd.f32 %v692_v23, %v1457_v0  ;;  %v694_v27 = vpop.f32.mrb[1].mxu1 }
 0x130   :  { %v582_v26 = vadd.f32 %v581_v24, %v1460_v19  ;;  %v583_v28 = vpop.f32.mrb[2].mxu0  ;;  %v695_v29 = vadd.f32 %v694_v27, %v1463_v20  ;;  %v696_v31 = vpop.f32.mrb[2].mxu1 }
 0x131   :  { %997 = vst [vmem:[#allocation8] sm:$0xff] %v580_v22  ;;  %v584_v30 = vadd.f32 %v583_v28, %v1454_v18  ;;  %v585_v32 = vpop.f32.mrb[3].mxu0  ;;  %999 = vst [vmem:[#allocation8 + $0x10] sm:$0xff] %v693_v25  ;;  %v697_v33 = vadd.f32 %v696_v31, %v1457_v0  ;;  %v698_v35 = vpop.f32.mrb[3].mxu1 }
 0x132   :  { %998 = vst [vmem:[#allocation8 + $0x8] sm:$0xff] %v582_v26  ;;  %v586_v34 = vadd.f32 %v585_v32, %v1460_v19  ;;  %1000 = vst [vmem:[#allocation8 + $0x18] sm:$0xff] %v695_v29  ;;  %v699_v36 = vadd.f32 %v698_v35, %v1463_v20 }
 0x133   :  { %1005 = vst [vmem:[#allocation8 + $0x40] sm:$0xff] %v584_v30  ;;  %1007 = vst [vmem:[#allocation8 + $0x50] sm:$0xff] %v697_v33 }
 0x134   :  { %1006 = vst [vmem:[#allocation8 + $0x48] sm:$0xff] %v586_v34  ;;  %1008 = vst [vmem:[#allocation8 + $0x58] sm:$0xff] %v699_v36 }
 0x136   :  { %v589_v37 = vpop.f32.mrb[4].mxu0  ;;  %v702_v39 = vpop.f32.mrb[4].mxu1 }
 0x137   :  { %v590_v38 = vadd.f32 %v589_v37, %v1454_v18  ;;  %v591_v40 = vpop.f32.mrb[5].mxu0  ;;  %v703_v41 = vadd.f32 %v702_v39, %v1457_v0  ;;  %v704_v43 = vpop.f32.mrb[5].mxu1 }
 0x138   :  { %v592_v42 = vadd.f32 %v591_v40, %v1460_v19  ;;  %v593_v44 = vpop.f32.mrb[6].mxu0  ;;  %v705_v45 = vadd.f32 %v704_v43, %v1463_v20  ;;  %v706_v47 = vpop.f32.mrb[6].mxu1 }
 0x139   :  { %1013 = vst [vmem:[#allocation8 + $0x80] sm:$0xff] %v590_v38  ;;  %v594_v46 = vadd.f32 %v593_v44, %v1454_v18  ;;  %v595_v48 = vpop.f32.mrb[7].mxu0  ;;  %1015 = vst [vmem:[#allocation8 + $0x90] sm:$0xff] %v703_v41  ;;  %v707_v49 = vadd.f32 %v706_v47, %v1457_v0  ;;  %v708_v51 = vpop.f32.mrb[7].mxu1 }
 0x13a   :  { %1014 = vst [vmem:[#allocation8 + $0x88] sm:$0xff] %v592_v42  ;;  %v596_v50 = vadd.f32 %v595_v48, %v1460_v19  ;;  %1016 = vst [vmem:[#allocation8 + $0x98] sm:$0xff] %v705_v45  ;;  %v709_v52 = vadd.f32 %v708_v51, %v1463_v20 }
 0x13b   :  { %1021 = vst [vmem:[#allocation8 + $0xc0] sm:$0xff] %v594_v46  ;;  %1023 = vst [vmem:[#allocation8 + $0xd0] sm:$0xff] %v707_v49 }
 0x13c   :  { %1022 = vst [vmem:[#allocation8 + $0xc8] sm:$0xff] %v596_v50  ;;  %1024 = vst [vmem:[#allocation8 + $0xd8] sm:$0xff] %v709_v52 }
 0x13e   :  { %v599_v53 = vpop.f32.mrb[8].mxu0  ;;  %v712_v55 = vpop.f32.mrb[8].mxu1 }
 0x13f   :  { %v600_v54 = vadd.f32 %v599_v53, %v1454_v18  ;;  %v601_v56 = vpop.f32.mrb[9].mxu0  ;;  %v713_v57 = vadd.f32 %v712_v55, %v1457_v0  ;;  %v714_v59 = vpop.f32.mrb[9].mxu1 }
 0x140   :  { %v602_v58 = vadd.f32 %v601_v56, %v1460_v19  ;;  %v603_v60 = vpop.f32.mrb[10].mxu0  ;;  %v715_v61 = vadd.f32 %v714_v59, %v1463_v20  ;;  %v716_v63 = vpop.f32.mrb[10].mxu1 }
 0x141   :  { %1029 = vst [vmem:[#allocation8 + $0x100] sm:$0xff] %v600_v54  ;;  %v604_v62 = vadd.f32 %v603_v60, %v1454_v18  ;;  %v605_v1 = vpop.f32.mrb[11].mxu0  ;;  %1031 = vst [vmem:[#allocation8 + $0x110] sm:$0xff] %v713_v57  ;;  %v717_v2 = vadd.f32 %v716_v63, %v1457_v0  ;;  %v718_v4 = vpop.f32.mrb[11].mxu1 }
 0x142   :  { %1030 = vst [vmem:[#allocation8 + $0x108] sm:$0xff] %v602_v58  ;;  %v606_v3 = vadd.f32 %v605_v1, %v1460_v19  ;;  %1032 = vst [vmem:[#allocation8 + $0x118] sm:$0xff] %v715_v61  ;;  %v719_v5 = vadd.f32 %v718_v4, %v1463_v20 }
 0x143   :  { %1037 = vst [vmem:[#allocation8 + $0x140] sm:$0xff] %v604_v62  ;;  %1039 = vst [vmem:[#allocation8 + $0x150] sm:$0xff] %v717_v2 }
 0x144   :  { %1038 = vst [vmem:[#allocation8 + $0x148] sm:$0xff] %v606_v3  ;;  %1040 = vst [vmem:[#allocation8 + $0x158] sm:$0xff] %v719_v5 }
 0x146   :  { %v609_v6 = vpop.f32.mrb[12].mxu0  ;;  %v722_v9 = vpop.f32.mrb[12].mxu1 }
 0x147   :  { %v610_v7 = vadd.f32 %v609_v6, %v1454_v18  ;;  %v611_v10 = vpop.f32.mrb[13].mxu0  ;;  %v723_v11 = vadd.f32 %v722_v9, %v1457_v0  ;;  %v724_v13 = vpop.f32.mrb[13].mxu1 }
 0x148   :  { %v612_v8 = vadd.f32 %v611_v10, %v1460_v19  ;;  %v613_v15 = vpop.f32.mrb[14].mxu0  ;;  %v725_v16 = vadd.f32 %v724_v13, %v1463_v20  ;;  %v726_v21 = vpop.f32.mrb[14].mxu1 }
 0x149   :  { %1045 = vst [vmem:[#allocation8 + $0x180] sm:$0xff] %v610_v7  ;;  %v614_v17 = vadd.f32 %v613_v15, %v1454_v18  ;;  %v615_v22 = vpop.f32.mrb[15].mxu0  ;;  %1047 = vst [vmem:[#allocation8 + $0x190] sm:$0xff] %v723_v11  ;;  %v727_v23 = vadd.f32 %v726_v21, %v1457_v0  ;;  %v728_v25 = vpop.f32.mrb[15].mxu1  ;;  %v155_v21 = vsub.s32 4, %v1445_v12 }
 0x14a   :  { %1046 = vst [vmem:[#allocation8 + $0x188] sm:$0xff] %v612_v8  ;;  %v616_v24 = vadd.f32 %v615_v22, %v1460_v19  ;;  %1048 = vst [vmem:[#allocation8 + $0x198] sm:$0xff] %v725_v16  ;;  %v729_v26 = vadd.f32 %v728_v25, %v1463_v20 }
 0x14b   :  { %1053 = vst [vmem:[#allocation8 + $0x1c0] sm:$0xff] %v614_v17  ;;  %1055 = vst [vmem:[#allocation8 + $0x1d0] sm:$0xff] %v727_v23 }
 0x14c   :  { %1054 = vst [vmem:[#allocation8 + $0x1c8] sm:$0xff] %v616_v24  ;;  %1056 = vst [vmem:[#allocation8 + $0x1d8] sm:$0xff] %v729_v26  ;;  %v163_v26 = vsub.s32 6, %v1445_v12 }
 0x14e   :  { %v619_v27 = vpop.f32.mrb[16].mxu0  ;;  %v732_v29 = vpop.f32.mrb[16].mxu1 }
 0x14f   :  { %v620_v28 = vadd.f32 %v619_v27, %v1454_v18  ;;  %v621_v30 = vpop.f32.mrb[17].mxu0  ;;  %v733_v31 = vadd.f32 %v732_v29, %v1457_v0  ;;  %v734_v33 = vpop.f32.mrb[17].mxu1  ;;  %v159_v27 = vsub.s32 5, %v1445_v12 }
 0x150   :  { %v622_v32 = vadd.f32 %v621_v30, %v1460_v19  ;;  %v623_v34 = vpop.f32.mrb[18].mxu0  ;;  %v735_v35 = vadd.f32 %v734_v33, %v1463_v20  ;;  %v736_v37 = vpop.f32.mrb[18].mxu1 }
 0x151   :  { %1061 = vst [vmem:[#allocation8 + $0x200] sm:$0xff] %v620_v28  ;;  %v624_v36 = vadd.f32 %v623_v34, %v1454_v18  ;;  %v625_v38 = vpop.f32.mrb[19].mxu0  ;;  %1063 = vst [vmem:[#allocation8 + $0x210] sm:$0xff] %v733_v31  ;;  %v737_v39 = vadd.f32 %v736_v37, %v1457_v0  ;;  %v738_v41 = vpop.f32.mrb[19].mxu1  ;;  %v1534_v37 = vrot.slane %v1448_v14, %v155_v21 }
 0x152   :  { %1062 = vst [vmem:[#allocation8 + $0x208] sm:$0xff] %v622_v32  ;;  %v626_v40 = vadd.f32 %v625_v38, %v1460_v19  ;;  %1064 = vst [vmem:[#allocation8 + $0x218] sm:$0xff] %v735_v35  ;;  %v739_v42 = vadd.f32 %v738_v41, %v1463_v20  ;;  %v167_v32 = vsub.s32 7, %v1445_v12  ;;  %v1540_v12 = vrot.slane %v1448_v14, %v159_v27 }
 0x153   :  { %1069 = vst [vmem:[#allocation8 + $0x240] sm:$0xff] %v624_v36  ;;  %1071 = vst [vmem:[#allocation8 + $0x250] sm:$0xff] %v737_v39 }
 0x154   :  { %1070 = vst [vmem:[#allocation8 + $0x248] sm:$0xff] %v626_v40  ;;  %1072 = vst [vmem:[#allocation8 + $0x258] sm:$0xff] %v739_v42 }
 0x156   :  { %v629_v43 = vpop.f32.mrb[20].mxu0  ;;  %v742_v45 = vpop.f32.mrb[20].mxu1 }
 0x157   :  { %v630_v44 = vadd.f32 %v629_v43, %v1454_v18  ;;  %v631_v46 = vpop.f32.mrb[21].mxu0  ;;  %v743_v47 = vadd.f32 %v742_v45, %v1457_v0  ;;  %v744_v49 = vpop.f32.mrb[21].mxu1 }
 0x158   :  { %v632_v48 = vadd.f32 %v631_v46, %v1460_v19  ;;  %v633_v50 = vpop.f32.mrb[22].mxu0  ;;  %v745_v51 = vadd.f32 %v744_v49, %v1463_v20  ;;  %v746_v53 = vpop.f32.mrb[22].mxu1 }
 0x159   :  { %1077 = vst [vmem:[#allocation8 + $0x280] sm:$0xff] %v630_v44  ;;  %v634_v52 = vadd.f32 %v633_v50, %v1454_v18  ;;  %v635_v54 = vpop.f32.mrb[23].mxu0  ;;  %1079 = vst [vmem:[#allocation8 + $0x290] sm:$0xff] %v743_v47  ;;  %v747_v55 = vadd.f32 %v746_v53, %v1457_v0  ;;  %v748_v57 = vpop.f32.mrb[23].mxu1 }
 0x15a   :  { %1078 = vst [vmem:[#allocation8 + $0x288] sm:$0xff] %v632_v48  ;;  %v636_v56 = vadd.f32 %v635_v54, %v1460_v19  ;;  %1080 = vst [vmem:[#allocation8 + $0x298] sm:$0xff] %v745_v51  ;;  %v749_v58 = vadd.f32 %v748_v57, %v1463_v20 }
 0x15b   :  { %1085 = vst [vmem:[#allocation8 + $0x2c0] sm:$0xff] %v634_v52  ;;  %1087 = vst [vmem:[#allocation8 + $0x2d0] sm:$0xff] %v747_v55 }
 0x15c   :  { %1086 = vst [vmem:[#allocation8 + $0x2c8] sm:$0xff] %v636_v56  ;;  %1088 = vst [vmem:[#allocation8 + $0x2d8] sm:$0xff] %v749_v58 }
 0x15e   :  { %v639_v59 = vpop.f32.mrb[24].mxu0  ;;  %v752_v61 = vpop.f32.mrb[24].mxu1 }
 0x15f   :  { %v640_v60 = vadd.f32 %v639_v59, %v1454_v18  ;;  %v641_v62 = vpop.f32.mrb[25].mxu0  ;;  %v753_v63 = vadd.f32 %v752_v61, %v1457_v0  ;;  %v754_v2 = vpop.f32.mrb[25].mxu1 }
 0x160   :  { %v642_v1 = vadd.f32 %v641_v62, %v1460_v19  ;;  %v643_v3 = vpop.f32.mrb[26].mxu0  ;;  %v755_v4 = vadd.f32 %v754_v2, %v1463_v20  ;;  %v756_v6 = vpop.f32.mrb[26].mxu1 }
 0x161   :  { %1093 = vst [vmem:[#allocation8 + $0x300] sm:$0xff] %v640_v60  ;;  %v644_v5 = vadd.f32 %v643_v3, %v1454_v18  ;;  %v645_v7 = vpop.f32.mrb[27].mxu0  ;;  %1095 = vst [vmem:[#allocation8 + $0x310] sm:$0xff] %v753_v63  ;;  %v757_v9 = vadd.f32 %v756_v6, %v1457_v0  ;;  %v758_v11 = vpop.f32.mrb[27].mxu1 }
 0x162   :  { %1094 = vst [vmem:[#allocation8 + $0x308] sm:$0xff] %v642_v1  ;;  %v646_v10 = vadd.f32 %v645_v7, %v1460_v19  ;;  %1096 = vst [vmem:[#allocation8 + $0x318] sm:$0xff] %v755_v4  ;;  %v759_v8 = vadd.f32 %v758_v11, %v1463_v20 }
 0x163   :  { %1101 = vst [vmem:[#allocation8 + $0x340] sm:$0xff] %v644_v5  ;;  %1103 = vst [vmem:[#allocation8 + $0x350] sm:$0xff] %v757_v9 }
 0x164   :  { %1102 = vst [vmem:[#allocation8 + $0x348] sm:$0xff] %v646_v10  ;;  %1104 = vst [vmem:[#allocation8 + $0x358] sm:$0xff] %v759_v8 }
 0x166   :  { %v649_v13 = vpop.f32.mrb[28].mxu0  ;;  %v762_v16 = vpop.f32.mrb[28].mxu1 }
 0x167   :  { %v650_v15 = vadd.f32 %v649_v13, %v1454_v18  ;;  %v651_v17 = vpop.f32.mrb[29].mxu0  ;;  %v763_v22 = vadd.f32 %v762_v16, %v1457_v0  ;;  %v764_v24 = vpop.f32.mrb[29].mxu1 }
 0x168   :  { %v652_v23 = vadd.f32 %v651_v17, %v1460_v19  ;;  %v653_v25 = vpop.f32.mrb[30].mxu0  ;;  %v765_v28 = vadd.f32 %v764_v24, %v1463_v20  ;;  %v766_v30 = vpop.f32.mrb[30].mxu1 }
 0x169   :  { %1109 = vst [vmem:[#allocation8 + $0x380] sm:$0xff] %v650_v15  ;;  %v654_v29 = vadd.f32 %v653_v25, %v1454_v18  ;;  %v655_v31 = vpop.f32.mrb[31].mxu0  ;;  %1111 = vst [vmem:[#allocation8 + $0x390] sm:$0xff] %v763_v22  ;;  %v767_v33 = vadd.f32 %v766_v30, %v1457_v0  ;;  %v768_v35 = vpop.f32.mrb[31].mxu1  ;;  %v1537_v18 = vrot.slane %v1448_v14, %v163_v26 }
 0x16a   :  { %1110 = vst [vmem:[#allocation8 + $0x388] sm:$0xff] %v652_v23  ;;  %v656_v34 = vadd.f32 %v655_v31, %v1460_v19  ;;  %1112 = vst [vmem:[#allocation8 + $0x398] sm:$0xff] %v765_v28  ;;  %v769_v36 = vadd.f32 %v768_v35, %v1463_v20  ;;  %v1543_v0 = vrot.slane %v1448_v14, %v167_v32 }
 0x16b   :  { %1117 = vst [vmem:[#allocation8 + $0x3c0] sm:$0xff] %v654_v29  ;;  %1119 = vst [vmem:[#allocation8 + $0x3d0] sm:$0xff] %v767_v33 }
 0x16c   :  { %1118 = vst [vmem:[#allocation8 + $0x3c8] sm:$0xff] %v656_v34  ;;  %1120 = vst [vmem:[#allocation8 + $0x3d8] sm:$0xff] %v769_v36 }
 0x16e   :  { %v805_v19 = vpop.f32.mrb[32].mxu0  ;;  %v918_v39 = vpop.f32.mrb[32].mxu1 }
 0x16f   :  { %v806_v38 = vadd.f32 %v805_v19, %v1534_v37  ;;  %v807_v20 = vpop.f32.mrb[33].mxu0  ;;  %v919_v40 = vadd.f32 %v918_v39, %v1537_v18  ;;  %v920_v42 = vpop.f32.mrb[33].mxu1 }
 0x170   :  { %v808_v41 = vadd.f32 %v807_v20, %v1540_v12  ;;  %v809_v43 = vpop.f32.mrb[34].mxu0  ;;  %v921_v44 = vadd.f32 %v920_v42, %v1543_v0  ;;  %v922_v46 = vpop.f32.mrb[34].mxu1 }
 0x171   :  { %1001 = vst [vmem:[#allocation8 + $0x20] sm:$0xff] %v806_v38  ;;  %v810_v45 = vadd.f32 %v809_v43, %v1534_v37  ;;  %v811_v47 = vpop.f32.mrb[35].mxu0  ;;  %1003 = vst [vmem:[#allocation8 + $0x30] sm:$0xff] %v919_v40  ;;  %v923_v14 = vadd.f32 %v922_v46, %v1537_v18  ;;  %v924_v49 = vpop.f32.mrb[35].mxu1 }
 0x172   :  { %1002 = vst [vmem:[#allocation8 + $0x28] sm:$0xff] %v808_v41  ;;  %v812_v48 = vadd.f32 %v811_v47, %v1540_v12  ;;  %1004 = vst [vmem:[#allocation8 + $0x38] sm:$0xff] %v921_v44  ;;  %v925_v50 = vadd.f32 %v924_v49, %v1543_v0 }
 0x173   :  { %1009 = vst [vmem:[#allocation8 + $0x60] sm:$0xff] %v810_v45  ;;  %1011 = vst [vmem:[#allocation8 + $0x70] sm:$0xff] %v923_v14 }
 0x174   :  { %1010 = vst [vmem:[#allocation8 + $0x68] sm:$0xff] %v812_v48  ;;  %1012 = vst [vmem:[#allocation8 + $0x78] sm:$0xff] %v925_v50 }
 0x176   :  { %v815_v51 = vpop.f32.mrb[36].mxu0  ;;  %v928_v53 = vpop.f32.mrb[36].mxu1 }
 0x177   :  { %v816_v52 = vadd.f32 %v815_v51, %v1534_v37  ;;  %v817_v54 = vpop.f32.mrb[37].mxu0  ;;  %v929_v55 = vadd.f32 %v928_v53, %v1537_v18  ;;  %v930_v57 = vpop.f32.mrb[37].mxu1 }
 0x178   :  { %v818_v56 = vadd.f32 %v817_v54, %v1540_v12  ;;  %v819_v58 = vpop.f32.mrb[38].mxu0  ;;  %v931_v59 = vadd.f32 %v930_v57, %v1543_v0  ;;  %v932_v61 = vpop.f32.mrb[38].mxu1 }
 0x179   :  { %1017 = vst [vmem:[#allocation8 + $0xa0] sm:$0xff] %v816_v52  ;;  %v820_v60 = vadd.f32 %v819_v58, %v1534_v37  ;;  %v821_v62 = vpop.f32.mrb[39].mxu0  ;;  %1019 = vst [vmem:[#allocation8 + $0xb0] sm:$0xff] %v929_v55  ;;  %v933_v63 = vadd.f32 %v932_v61, %v1537_v18  ;;  %v934_v2 = vpop.f32.mrb[39].mxu1 }
 0x17a   :  { %1018 = vst [vmem:[#allocation8 + $0xa8] sm:$0xff] %v818_v56  ;;  %v822_v1 = vadd.f32 %v821_v62, %v1540_v12  ;;  %1020 = vst [vmem:[#allocation8 + $0xb8] sm:$0xff] %v931_v59  ;;  %v935_v3 = vadd.f32 %v934_v2, %v1543_v0 }
 0x17b   :  { %1025 = vst [vmem:[#allocation8 + $0xe0] sm:$0xff] %v820_v60  ;;  %1027 = vst [vmem:[#allocation8 + $0xf0] sm:$0xff] %v933_v63 }
 0x17c   :  { %1026 = vst [vmem:[#allocation8 + $0xe8] sm:$0xff] %v822_v1  ;;  %1028 = vst [vmem:[#allocation8 + $0xf8] sm:$0xff] %v935_v3 }
 0x17e   :  { %v825_v4 = vpop.f32.mrb[40].mxu0  ;;  %v938_v6 = vpop.f32.mrb[40].mxu1 }
 0x17f   :  { %v826_v5 = vadd.f32 %v825_v4, %v1534_v37  ;;  %v827_v7 = vpop.f32.mrb[41].mxu0  ;;  %v939_v9 = vadd.f32 %v938_v6, %v1537_v18  ;;  %v940_v11 = vpop.f32.mrb[41].mxu1 }
 0x180   :  { %v828_v10 = vadd.f32 %v827_v7, %v1540_v12  ;;  %v829_v8 = vpop.f32.mrb[42].mxu0  ;;  %v941_v13 = vadd.f32 %v940_v11, %v1543_v0  ;;  %v942_v16 = vpop.f32.mrb[42].mxu1 }
 0x181   :  { %1033 = vst [vmem:[#allocation8 + $0x120] sm:$0xff] %v826_v5  ;;  %v830_v15 = vadd.f32 %v829_v8, %v1534_v37  ;;  %v831_v17 = vpop.f32.mrb[43].mxu0  ;;  %1035 = vst [vmem:[#allocation8 + $0x130] sm:$0xff] %v939_v9  ;;  %v943_v21 = vadd.f32 %v942_v16, %v1537_v18  ;;  %v944_v23 = vpop.f32.mrb[43].mxu1 }
 0x182   :  { %1034 = vst [vmem:[#allocation8 + $0x128] sm:$0xff] %v828_v10  ;;  %v832_v22 = vadd.f32 %v831_v17, %v1540_v12  ;;  %1036 = vst [vmem:[#allocation8 + $0x138] sm:$0xff] %v941_v13  ;;  %v945_v24 = vadd.f32 %v944_v23, %v1543_v0 }
 0x183   :  { %1041 = vst [vmem:[#allocation8 + $0x160] sm:$0xff] %v830_v15  ;;  %1043 = vst [vmem:[#allocation8 + $0x170] sm:$0xff] %v943_v21 }
 0x184   :  { %1042 = vst [vmem:[#allocation8 + $0x168] sm:$0xff] %v832_v22  ;;  %1044 = vst [vmem:[#allocation8 + $0x178] sm:$0xff] %v945_v24 }
 0x186   :  { %v835_v25 = vpop.f32.mrb[44].mxu0  ;;  %v948_v27 = vpop.f32.mrb[44].mxu1 }
 0x187   :  { %v836_v26 = vadd.f32 %v835_v25, %v1534_v37  ;;  %v837_v28 = vpop.f32.mrb[45].mxu0  ;;  %v949_v29 = vadd.f32 %v948_v27, %v1537_v18  ;;  %v950_v31 = vpop.f32.mrb[45].mxu1 }
 0x188   :  { %v838_v30 = vadd.f32 %v837_v28, %v1540_v12  ;;  %v839_v32 = vpop.f32.mrb[46].mxu0  ;;  %v951_v33 = vadd.f32 %v950_v31, %v1543_v0  ;;  %v952_v35 = vpop.f32.mrb[46].mxu1 }
 0x189   :  { %1049 = vst [vmem:[#allocation8 + $0x1a0] sm:$0xff] %v836_v26  ;;  %v840_v34 = vadd.f32 %v839_v32, %v1534_v37  ;;  %v841_v36 = vpop.f32.mrb[47].mxu0  ;;  %1051 = vst [vmem:[#allocation8 + $0x1b0] sm:$0xff] %v949_v29  ;;  %v953_v19 = vadd.f32 %v952_v35, %v1537_v18  ;;  %v954_v39 = vpop.f32.mrb[47].mxu1 }
 0x18a   :  { %1050 = vst [vmem:[#allocation8 + $0x1a8] sm:$0xff] %v838_v30  ;;  %v842_v38 = vadd.f32 %v841_v36, %v1540_v12  ;;  %1052 = vst [vmem:[#allocation8 + $0x1b8] sm:$0xff] %v951_v33  ;;  %v955_v20 = vadd.f32 %v954_v39, %v1543_v0 }
 0x18b   :  { %1057 = vst [vmem:[#allocation8 + $0x1e0] sm:$0xff] %v840_v34  ;;  %1059 = vst [vmem:[#allocation8 + $0x1f0] sm:$0xff] %v953_v19 }
 0x18c   :  { %1058 = vst [vmem:[#allocation8 + $0x1e8] sm:$0xff] %v842_v38  ;;  %1060 = vst [vmem:[#allocation8 + $0x1f8] sm:$0xff] %v955_v20 }
 0x18e   :  { %v845_v40 = vpop.f32.mrb[48].mxu0  ;;  %v958_v42 = vpop.f32.mrb[48].mxu1 }
 0x18f   :  { %v846_v41 = vadd.f32 %v845_v40, %v1534_v37  ;;  %v847_v43 = vpop.f32.mrb[49].mxu0  ;;  %v959_v44 = vadd.f32 %v958_v42, %v1537_v18  ;;  %v960_v46 = vpop.f32.mrb[49].mxu1 }
 0x190   :  { %v848_v45 = vadd.f32 %v847_v43, %v1540_v12  ;;  %v849_v47 = vpop.f32.mrb[50].mxu0  ;;  %v961_v14 = vadd.f32 %v960_v46, %v1543_v0  ;;  %v962_v49 = vpop.f32.mrb[50].mxu1 }
 0x191   :  { %1065 = vst [vmem:[#allocation8 + $0x220] sm:$0xff] %v846_v41  ;;  %v850_v48 = vadd.f32 %v849_v47, %v1534_v37  ;;  %v851_v50 = vpop.f32.mrb[51].mxu0  ;;  %1067 = vst [vmem:[#allocation8 + $0x230] sm:$0xff] %v959_v44  ;;  %v963_v51 = vadd.f32 %v962_v49, %v1537_v18  ;;  %v964_v53 = vpop.f32.mrb[51].mxu1 }
 0x192   :  { %1066 = vst [vmem:[#allocation8 + $0x228] sm:$0xff] %v848_v45  ;;  %v852_v52 = vadd.f32 %v851_v50, %v1540_v12  ;;  %1068 = vst [vmem:[#allocation8 + $0x238] sm:$0xff] %v961_v14  ;;  %v965_v54 = vadd.f32 %v964_v53, %v1543_v0 }
 0x193   :  { %1073 = vst [vmem:[#allocation8 + $0x260] sm:$0xff] %v850_v48  ;;  %1075 = vst [vmem:[#allocation8 + $0x270] sm:$0xff] %v963_v51 }
 0x194   :  { %1074 = vst [vmem:[#allocation8 + $0x268] sm:$0xff] %v852_v52  ;;  %1076 = vst [vmem:[#allocation8 + $0x278] sm:$0xff] %v965_v54 }
 0x196   :  { %v855_v55 = vpop.f32.mrb[52].mxu0  ;;  %v968_v57 = vpop.f32.mrb[52].mxu1 }
 0x197   :  { %v856_v56 = vadd.f32 %v855_v55, %v1534_v37  ;;  %v857_v58 = vpop.f32.mrb[53].mxu0  ;;  %v969_v59 = vadd.f32 %v968_v57, %v1537_v18  ;;  %v970_v61 = vpop.f32.mrb[53].mxu1 }
 0x198   :  { %v858_v60 = vadd.f32 %v857_v58, %v1540_v12  ;;  %v859_v62 = vpop.f32.mrb[54].mxu0  ;;  %v971_v63 = vadd.f32 %v970_v61, %v1543_v0  ;;  %v972_v2 = vpop.f32.mrb[54].mxu1 }
 0x199   :  { %1081 = vst [vmem:[#allocation8 + $0x2a0] sm:$0xff] %v856_v56  ;;  %v860_v1 = vadd.f32 %v859_v62, %v1534_v37  ;;  %v861_v3 = vpop.f32.mrb[55].mxu0  ;;  %1083 = vst [vmem:[#allocation8 + $0x2b0] sm:$0xff] %v969_v59  ;;  %v973_v4 = vadd.f32 %v972_v2, %v1537_v18  ;;  %v974_v6 = vpop.f32.mrb[55].mxu1 }
 0x19a   :  { %1082 = vst [vmem:[#allocation8 + $0x2a8] sm:$0xff] %v858_v60  ;;  %v862_v5 = vadd.f32 %v861_v3, %v1540_v12  ;;  %1084 = vst [vmem:[#allocation8 + $0x2b8] sm:$0xff] %v971_v63  ;;  %v975_v7 = vadd.f32 %v974_v6, %v1543_v0 }
 0x19b   :  { %1089 = vst [vmem:[#allocation8 + $0x2e0] sm:$0xff] %v860_v1  ;;  %1091 = vst [vmem:[#allocation8 + $0x2f0] sm:$0xff] %v973_v4 }
 0x19c   :  { %1090 = vst [vmem:[#allocation8 + $0x2e8] sm:$0xff] %v862_v5  ;;  %1092 = vst [vmem:[#allocation8 + $0x2f8] sm:$0xff] %v975_v7 }
 0x19e   :  { %v865_v9 = vpop.f32.mrb[56].mxu0  ;;  %v978_v11 = vpop.f32.mrb[56].mxu1 }
 0x19f   :  { %v866_v10 = vadd.f32 %v865_v9, %v1534_v37  ;;  %v867_v8 = vpop.f32.mrb[57].mxu0  ;;  %v979_v13 = vadd.f32 %v978_v11, %v1537_v18  ;;  %v980_v16 = vpop.f32.mrb[57].mxu1 }
 0x1a0   :  { %v868_v15 = vadd.f32 %v867_v8, %v1540_v12  ;;  %v869_v17 = vpop.f32.mrb[58].mxu0  ;;  %v981_v21 = vadd.f32 %v980_v16, %v1543_v0  ;;  %v982_v23 = vpop.f32.mrb[58].mxu1 }
 0x1a1   :  { %1097 = vst [vmem:[#allocation8 + $0x320] sm:$0xff] %v866_v10  ;;  %v870_v22 = vadd.f32 %v869_v17, %v1534_v37  ;;  %v871_v24 = vpop.f32.mrb[59].mxu0  ;;  %1099 = vst [vmem:[#allocation8 + $0x330] sm:$0xff] %v979_v13  ;;  %v983_v25 = vadd.f32 %v982_v23, %v1537_v18  ;;  %v984_v27 = vpop.f32.mrb[59].mxu1 }
 0x1a2   :  { %1098 = vst [vmem:[#allocation8 + $0x328] sm:$0xff] %v868_v15  ;;  %v872_v26 = vadd.f32 %v871_v24, %v1540_v12  ;;  %1100 = vst [vmem:[#allocation8 + $0x338] sm:$0xff] %v981_v21  ;;  %v985_v28 = vadd.f32 %v984_v27, %v1543_v0 }
 0x1a3   :  { %1105 = vst [vmem:[#allocation8 + $0x360] sm:$0xff] %v870_v22  ;;  %1107 = vst [vmem:[#allocation8 + $0x370] sm:$0xff] %v983_v25 }
 0x1a4   :  { %1106 = vst [vmem:[#allocation8 + $0x368] sm:$0xff] %v872_v26  ;;  %1108 = vst [vmem:[#allocation8 + $0x378] sm:$0xff] %v985_v28 }
 0x1a6   :  { %v875_v29 = vpop.f32.mrb[60].mxu0  ;;  %v988_v31 = vpop.f32.mrb[60].mxu1 }
 0x1a7   :  { %v876_v30 = vadd.f32 %v875_v29, %v1534_v37  ;;  %v877_v32 = vpop.f32.mrb[61].mxu0  ;;  %v989_v33 = vadd.f32 %v988_v31, %v1537_v18  ;;  %v990_v35 = vpop.f32.mrb[61].mxu1 }
 0x1a8   :  { %v878_v34 = vadd.f32 %v877_v32, %v1540_v12  ;;  %v879_v36 = vpop.f32.mrb[62].mxu0  ;;  %v991_v19 = vadd.f32 %v990_v35, %v1543_v0  ;;  %v992_v39 = vpop.f32.mrb[62].mxu1 }
 0x1a9   :  { %1113 = vst [vmem:[#allocation8 + $0x3a0] sm:$0xff] %v876_v30  ;;  %v880_v38 = vadd.f32 %v879_v36, %v1534_v37  ;;  %v881_v20 = vpop.f32.mrb[63].mxu0  ;;  %1115 = vst [vmem:[#allocation8 + $0x3b0] sm:$0xff] %v989_v33  ;;  %v993_v40 = vadd.f32 %v992_v39, %v1537_v18  ;;  %v994_v42 = vpop.f32.mrb[63].mxu1 }
 0x1aa   :  { %1114 = vst [vmem:[#allocation8 + $0x3a8] sm:$0xff] %v878_v34  ;;  %v882_v41 = vadd.f32 %v881_v20, %v1540_v12  ;;  %1116 = vst [vmem:[#allocation8 + $0x3b8] sm:$0xff] %v991_v19  ;;  %v995_v43 = vadd.f32 %v994_v42, %v1543_v0 }
 0x1ab   :  { %1121 = vst [vmem:[#allocation8 + $0x3e0] sm:$0xff] %v880_v38  ;;  %1123 = vst [vmem:[#allocation8 + $0x3f0] sm:$0xff] %v993_v40 }
 0x1ac   :  { %1122 = vst [vmem:[#allocation8 + $0x3e8] sm:$0xff] %v882_v41  ;;  %1124 = vst [vmem:[#allocation8 + $0x3f8] sm:$0xff] %v995_v43 }
 0x1ad   :  { %1310 = shalt.err (!%p1307_p0)
}
 0x1ae   :  { %s1311_s27 = scalar_lea.hbm %s1625_s3, 16384 }
 0x1af   :  { %p1312_p1 = scmp.ne.s32.totalorder %s1625_s3, %s1311_s27  ;;  %p1315_p2 = scmp.lt.u32.totalorder %s1311_s27, %s1625_s3 }
 0x1b1   :  { %p1317_p3 = pnand %p1315_p2, %p1312_p1 }
 0x1b3   :  { %1320 = shalt.err (!%p1317_p3)
}
 0x1b4   :  { %s1336_s5 = smov 1024  }
 0x1b5   :  { %1136 = dma.vmem_to_hbm [thread:$0]  %s1131_s23, 16384, %s1625_s3, [#allocation4], %s1336_s5, %s1336_s5, %s1331_s1  }
 0x1b6   :  { %1325 = dma.done.wait [#allocation4], 16384  }
 0x1b7   :  { %1326 = vsyncadd [#allocation4], 4294950912 }
 0x1b8   :  { %1140 = vsyncpa [#allocation3], 1 }
 0x1b9   :  { %1141 = vsyncpa [#allocation6], 1 }
 0x1ba   :  { %1142 = vsyncpa [#allocation4], 1 }

</bundles_post_ra>
